<compile_context>
chip_gen: v5e
topology: v5e:2x2
jax: 0.10.0
libtpu: 0.0.40
codegen_flags: <defaults>
</compile_context>

<pallas_src>
import functools

import jax
import jax.numpy as jnp
from jax.experimental import pallas as pl
from jax.experimental.pallas import tpu as pltpu

N_ACTIONS = 3 * 3          # 9
N_LAYERS = 256
N_STATES = 19
AV_COLS = N_ACTIONS + 2    # 9 advantage cols + 1 value col + 1 folded mean(A) col


def duel_dqn_kernel(x_ref, w1_ref, b1_ref, wav_ref, bav_ref, wo_ref, bo_ref, out_ref):
    # fc1 + relu. x arrives as f32; cast to bf16 on the VPU (hidden under the
    # output DMA), accumulate in f32 on the MXU.
    x = x_ref[...].astype(jnp.bfloat16)                                   # (TB, 19)
    h = jnp.dot(x, w1_ref[...], preferred_element_type=jnp.float32)
    h = jnp.maximum(h + b1_ref[...], 0.0)                                 # (TB, 256) f32

    # Fused advantage / value / mean(A) head:
    #   cols [0:9] = A, col [9] = V, col [10] = mean(A) (folded into the matmul).
    av = jnp.dot(h.astype(wav_ref.dtype), wav_ref[...],
                 preferred_element_type=jnp.float32) + bav_ref[...]       # (TB, 11) f32
    a = av[:, :N_ACTIONS]
    v = av[:, N_ACTIONS:N_ACTIONS + 1]
    a_mean = av[:, N_ACTIONS + 1:N_ACTIONS + 2]

    # Dueling combine: Q = relu(V + (A - mean(A)))  (broadcast replaces torch.cat).
    q = jnp.maximum(v + (a - a_mean), 0.0)                                # (TB, 9) f32

    # Output layer, written as a narrow (TB, 9) block (9 == full minor dim).
    out = jnp.dot(q.astype(wo_ref.dtype), wo_ref[...],
                  preferred_element_type=jnp.float32) + bo_ref[...]       # (TB, 9) f32
    out_ref[...] = out.astype(out_ref.dtype)


def pack_params(params, compute_dtype=jnp.bfloat16):
    """One-time repacking of PyTorch-layout params into the kernel layout."""
    a_wt = params["A_w"].T                                 # (256, 9)
    v_wt = params["V_w"].T                                 # (256, 1)
    mean_col = jnp.mean(a_wt, axis=1, keepdims=True)       # (256, 1) == (1/9)*sum_j A_w[j]
    return {
        "w1":   params["fc1_w"].T.astype(compute_dtype),                     # (19, 256)
        "b1":   params["fc1_b"][None, :].astype(jnp.float32),                # (1, 256)
        "w_av": jnp.concatenate([a_wt, v_wt, mean_col],
                                axis=1).astype(compute_dtype),               # (256, 11)
        "b_av": jnp.concatenate(
            [params["A_b"], params["V_b"],
             jnp.mean(params["A_b"], keepdims=True)])[None, :]
            .astype(jnp.float32),                                            # (1, 11)
        "wo":   params["out_w"].T.astype(compute_dtype),                     # (9, 9)
        "bo":   params["out_b"][None, :].astype(jnp.float32),                # (1, 9)
    }


def _choose_tile(batch, tile_b):
    """Pick a batch tile (multiple of 16) and padded batch."""
    b16 = max(16, -(-batch // 16) * 16)            # batch rounded up to a multiple of 16
    tb = min(tile_b, b16)
    # Guarantee >= 2 grid steps once the batch is big enough so the "parallel"
    # grid axis can feed both v7x TensorCores.
    if tb >= b16 and b16 >= 64:
        tb = -(-(b16 // 2) // 16) * 16
    tb = max(16, tb)
    b_pad = -(-batch // tb) * tb
    return tb, b_pad


@functools.partial(jax.jit, static_argnames=("tile_b",))
def duel_dqn_forward(x, packed, tile_b=2048):
    """x: (B, N_STATES) float32. packed: output of pack_params()."""
    B = x.shape[0]
    tb, b_pad = _choose_tile(B, tile_b)
    x_p = x if b_pad == B else jnp.pad(x, ((0, b_pad - B), (0, 0)))
    grid = (b_pad // tb,)

    flops = 2 * b_pad * (N_STATES * N_LAYERS
                         + N_LAYERS * AV_COLS
                         + N_ACTIONS * N_ACTIONS)
    bytes_accessed = (x_p.size * 4 + b_pad * N_ACTIONS * 4
                      + packed["w1"].size * 2 + packed["b1"].size * 4
                      + packed["w_av"].size * 2 + packed["b_av"].size * 4
                      + packed["wo"].size * 2 + packed["bo"].size * 4)

    out = pl.pallas_call(
        duel_dqn_kernel,
        out_shape=jax.ShapeDtypeStruct((b_pad, N_ACTIONS), jnp.float32),
        grid=grid,
        in_specs=[
            pl.BlockSpec((tb, N_STATES), lambda i: (i, 0)),            # x: tiled over batch
            pl.BlockSpec((N_STATES, N_LAYERS), lambda i: (0, 0)),      # weights VMEM-resident
            pl.BlockSpec((1, N_LAYERS), lambda i: (0, 0)),
            pl.BlockSpec((N_LAYERS, AV_COLS), lambda i: (0, 0)),
            pl.BlockSpec((1, AV_COLS), lambda i: (0, 0)),
            pl.BlockSpec((N_ACTIONS, N_ACTIONS), lambda i: (0, 0)),
            pl.BlockSpec((1, N_ACTIONS), lambda i: (0, 0)),
        ],
        out_specs=pl.BlockSpec((tb, N_ACTIONS), lambda i: (i, 0)),
        compiler_params=pltpu.CompilerParams(
            dimension_semantics=("parallel",),
            vmem_limit_bytes=32 * 1024 * 1024),
        cost_estimate=pl.CostEstimate(flops=flops, transcendentals=0,
                                      bytes_accessed=bytes_accessed),
    )(x_p, packed["w1"], packed["b1"], packed["w_av"], packed["b_av"],
      packed["wo"], packed["bo"])

    return out if b_pad == B else out[:B]


def reference_forward_f32(x, params):
    """Pure f32 reference mirroring the PyTorch module."""
    h = jnp.maximum(x @ params["fc1_w"].T + params["fc1_b"], 0.0)
    a = h @ params["A_w"].T + params["A_b"]
    v = h @ params["V_w"].T + params["V_b"]
    q = jnp.maximum(v + (a - jnp.mean(a, axis=1, keepdims=True)), 0.0)
    return q @ params["out_w"].T + params["out_b"]


def reference_forward_matched(x, packed):
    """Mirrors the kernel's bf16-input / f32-accumulate math on the packed weights."""
    bf = jnp.bfloat16
    h = jnp.dot(x.astype(bf), packed["w1"], preferred_element_type=jnp.float32)
    h = jnp.maximum(h + packed["b1"], 0.0)
    av = jnp.dot(h.astype(bf), packed["w_av"],
                 preferred_element_type=jnp.float32) + packed["b_av"]
    a = av[:, :N_ACTIONS]
    v = av[:, N_ACTIONS:N_ACTIONS + 1]
    am = av[:, N_ACTIONS + 1:N_ACTIONS + 2]
    q = jnp.maximum(v + (a - am), 0.0)
    return jnp.dot(q.astype(bf), packed["wo"],
                   preferred_element_type=jnp.float32) + packed["bo"]


def init_params(key):
    """Deterministic init mimicking the module: weights ~ N(0, 0.1), small biases."""
    ks = jax.random.split(key, 8)

    def nrm(k, shape):
        return (0.1 * jax.random.normal(k, shape)).astype(jnp.float32)

    def unif(k, shape, fan_in):
        bound = 1.0 / (fan_in ** 0.5)
        return jax.random.uniform(k, shape, jnp.float32, -bound, bound)

    return {
        "fc1_w": nrm(ks[0], (N_LAYERS, N_STATES)),
        "fc1_b": unif(ks[1], (N_LAYERS,), N_STATES),
        "A_w":   nrm(ks[2], (N_ACTIONS, N_LAYERS)),
        "A_b":   unif(ks[3], (N_ACTIONS,), N_LAYERS),
        "V_w":   nrm(ks[4], (1, N_LAYERS)),
        "V_b":   unif(ks[5], (1,), N_LAYERS),
        "out_w": nrm(ks[6], (N_ACTIONS, N_ACTIONS)),
        "out_b": unif(ks[7], (N_ACTIONS,), N_ACTIONS),
    }


if __name__ == "__main__":
    key = jax.random.PRNGKey(0)
    kx, kx2, kp = jax.random.split(key, 3)
    params = init_params(kp)
    packed = pack_params(params)   # hoisted: repacked once, reused across calls

    # Small case (single grid step).
    B = 8
    x = jax.random.normal(kx, (B, N_STATES), dtype=jnp.float32)
    out = jax.block_until_ready(duel_dqn_forward(x, packed))
    assert out.shape == (B, N_ACTIONS)
    assert jnp.allclose(out, reference_forward_matched(x, packed), atol=5e-3, rtol=5e-3)
    assert jnp.allclose(out, reference_forward_f32(x, params), atol=5e-2, rtol=5e-2)

    # Ragged batch (exercises batch padding and the >=2-grid-step path).
    B2 = 70
    x2 = jax.random.normal(kx2, (B2, N_STATES), dtype=jnp.float32)
    out2 = jax.block_until_ready(duel_dqn_forward(x2, packed))
    assert out2.shape == (B2, N_ACTIONS)
    assert jnp.allclose(out2, reference_forward_matched(x2, packed), atol=5e-3, rtol=5e-3)
    assert jnp.allclose(out2, reference_forward_f32(x2, params), atol=5e-2, rtol=5e-2)

    print("KERNEL_OK")
</pallas_src>

<mosaic_0001>
module attributes {stable_mosaic.version = 11 : i64} {
  func.func @duel_dqn_kernel(%arg0: i32, %arg1: memref<16x19xf32, #tpu.memory_space<vmem>>, %arg2: memref<19x256xbf16, #tpu.memory_space<vmem>>, %arg3: memref<1x256xf32, #tpu.memory_space<vmem>>, %arg4: memref<256x11xbf16, #tpu.memory_space<vmem>>, %arg5: memref<1x11xf32, #tpu.memory_space<vmem>>, %arg6: memref<9x9xbf16, #tpu.memory_space<vmem>>, %arg7: memref<1x9xf32, #tpu.memory_space<vmem>>, %arg8: memref<16x9xf32, #tpu.memory_space<vmem>>) attributes {dimension_semantics = [#tpu.dimension_semantics<parallel>], iteration_bounds = array<i64: 1>, scalar_prefetch = 0 : i64, scratch_operands = 0 : i64, tpu.core_type = #tpu.core_type<tc>, window_params = [{transform_indices = @transform_0, window_bounds = array<i64: 16, 19>}, {pipeline_mode = #tpu.pipeline_mode<synchronous>, transform_indices = @transform_1, window_bounds = array<i64: 19, 256>}, {pipeline_mode = #tpu.pipeline_mode<synchronous>, transform_indices = @transform_2, window_bounds = array<i64: 1, 256>}, {pipeline_mode = #tpu.pipeline_mode<synchronous>, transform_indices = @transform_3, window_bounds = array<i64: 256, 11>}, {pipeline_mode = #tpu.pipeline_mode<synchronous>, transform_indices = @transform_4, window_bounds = array<i64: 1, 11>}, {pipeline_mode = #tpu.pipeline_mode<synchronous>, transform_indices = @transform_5, window_bounds = array<i64: 9, 9>}, {pipeline_mode = #tpu.pipeline_mode<synchronous>, transform_indices = @transform_6, window_bounds = array<i64: 1, 9>}, {transform_indices = @transform_7, window_bounds = array<i64: 16, 9>}]} {
    %c0 = arith.constant 0 : index
    %c0_0 = arith.constant 0 : index
    %0 = vector.load %arg1[%c0, %c0_0] : memref<16x19xf32, #tpu.memory_space<vmem>>, vector<16x19xf32>
    %1 = arith.truncf %0 : vector<16x19xf32> to vector<16x19xbf16>
    %c0_1 = arith.constant 0 : index
    %c0_2 = arith.constant 0 : index
    %2 = vector.load %arg2[%c0_1, %c0_2] : memref<19x256xbf16, #tpu.memory_space<vmem>>, vector<19x256xbf16>
    %cst = arith.constant dense<0.000000e+00> : vector<16x256xf32>
    %3 = tpu.matmul %1, %2, %cst {dimension_numbers = #tpu.dot_dimension_numbers<[1], [0], [0], [1], [0, 0, 1, 1], [], []>} : vector<16x19xbf16>, vector<19x256xbf16>, vector<16x256xf32> -> vector<16x256xf32>
    %c0_3 = arith.constant 0 : index
    %c0_4 = arith.constant 0 : index
    %4 = vector.load %arg3[%c0_3, %c0_4] : memref<1x256xf32, #tpu.memory_space<vmem>>, vector<1x256xf32>
    %5 = vector.broadcast %4 : vector<1x256xf32> to vector<16x256xf32>
    %6 = arith.addf %3, %5 : vector<16x256xf32>
    %cst_5 = arith.constant 0.000000e+00 : f32
    %7 = vector.broadcast %cst_5 : f32 to vector<16x256xf32>
    %8 = arith.maximumf %6, %7 : vector<16x256xf32>
    %9 = arith.truncf %8 : vector<16x256xf32> to vector<16x256xbf16>
    %c0_6 = arith.constant 0 : index
    %c0_7 = arith.constant 0 : index
    %10 = vector.load %arg4[%c0_6, %c0_7] : memref<256x11xbf16, #tpu.memory_space<vmem>>, vector<256x11xbf16>
    %cst_8 = arith.constant dense<0.000000e+00> : vector<16x11xf32>
    %11 = tpu.matmul %9, %10, %cst_8 {dimension_numbers = #tpu.dot_dimension_numbers<[1], [0], [0], [1], [0, 0, 1, 1], [], []>} : vector<16x256xbf16>, vector<256x11xbf16>, vector<16x11xf32> -> vector<16x11xf32>
    %c0_9 = arith.constant 0 : index
    %c0_10 = arith.constant 0 : index
    %12 = vector.load %arg5[%c0_9, %c0_10] : memref<1x11xf32, #tpu.memory_space<vmem>>, vector<1x11xf32>
    %13 = vector.broadcast %12 : vector<1x11xf32> to vector<16x11xf32>
    %14 = arith.addf %11, %13 : vector<16x11xf32>
    %15 = vector.extract_strided_slice %14 {offsets = [0, 0], sizes = [16, 9], strides = [1, 1]} : vector<16x11xf32> to vector<16x9xf32>
    %16 = vector.extract_strided_slice %14 {offsets = [0, 9], sizes = [16, 1], strides = [1, 1]} : vector<16x11xf32> to vector<16x1xf32>
    %17 = vector.extract_strided_slice %14 {offsets = [0, 10], sizes = [16, 1], strides = [1, 1]} : vector<16x11xf32> to vector<16x1xf32>
    %18 = vector.broadcast %17 : vector<16x1xf32> to vector<16x9xf32>
    %19 = arith.subf %15, %18 : vector<16x9xf32>
    %20 = vector.broadcast %16 : vector<16x1xf32> to vector<16x9xf32>
    %21 = arith.addf %20, %19 : vector<16x9xf32>
    %cst_11 = arith.constant 0.000000e+00 : f32
    %22 = vector.broadcast %cst_11 : f32 to vector<16x9xf32>
    %23 = arith.maximumf %21, %22 : vector<16x9xf32>
    %24 = arith.truncf %23 : vector<16x9xf32> to vector<16x9xbf16>
    %c0_12 = arith.constant 0 : index
    %c0_13 = arith.constant 0 : index
    %25 = vector.load %arg6[%c0_12, %c0_13] : memref<9x9xbf16, #tpu.memory_space<vmem>>, vector<9x9xbf16>
    %cst_14 = arith.constant dense<0.000000e+00> : vector<16x9xf32>
    %26 = tpu.matmul %24, %25, %cst_14 {dimension_numbers = #tpu.dot_dimension_numbers<[1], [0], [0], [1], [0, 0, 1, 1], [], []>} : vector<16x9xbf16>, vector<9x9xbf16>, vector<16x9xf32> -> vector<16x9xf32>
    %c0_15 = arith.constant 0 : index
    %c0_16 = arith.constant 0 : index
    %27 = vector.load %arg7[%c0_15, %c0_16] : memref<1x9xf32, #tpu.memory_space<vmem>>, vector<1x9xf32>
    %28 = vector.broadcast %27 : vector<1x9xf32> to vector<16x9xf32>
    %29 = arith.addf %26, %28 : vector<16x9xf32>
    %c0_17 = arith.constant 0 : index
    %c0_18 = arith.constant 0 : index
    %30 = vector.load %arg8[%c0_17, %c0_18] : memref<16x9xf32, #tpu.memory_space<vmem>>, vector<16x9xf32>
    tpu.vector_store %arg8[%c0_17, %c0_18], %29 {strides = array<i32>} : memref<16x9xf32, #tpu.memory_space<vmem>>, vector<16x9xf32>,
    return
  }
  func.func @transform_0(%arg0: i32) -> (i32, i32) {
    %c0_i32 = arith.constant 0 : i32
    %c0_i32_0 = arith.constant 0 : i32
    return %arg0, %c0_i32 : i32, i32
  }
  func.func @transform_1(%arg0: i32) -> (i32, i32) {
    %c0_i32 = arith.constant 0 : i32
    %c0_i32_0 = arith.constant 0 : i32
    %c0_i32_1 = arith.constant 0 : i32
    return %c0_i32, %c0_i32_0 : i32, i32
  }
  func.func @transform_2(%arg0: i32) -> (i32, i32) {
    %c0_i32 = arith.constant 0 : i32
    %c0_i32_0 = arith.constant 0 : i32
    %c0_i32_1 = arith.constant 0 : i32
    return %c0_i32, %c0_i32_0 : i32, i32
  }
  func.func @transform_3(%arg0: i32) -> (i32, i32) {
    %c0_i32 = arith.constant 0 : i32
    %c0_i32_0 = arith.constant 0 : i32
    %c0_i32_1 = arith.constant 0 : i32
    return %c0_i32, %c0_i32_0 : i32, i32
  }
  func.func @transform_4(%arg0: i32) -> (i32, i32) {
    %c0_i32 = arith.constant 0 : i32
    %c0_i32_0 = arith.constant 0 : i32
    %c0_i32_1 = arith.constant 0 : i32
    return %c0_i32, %c0_i32_0 : i32, i32
  }
  func.func @transform_5(%arg0: i32) -> (i32, i32) {
    %c0_i32 = arith.constant 0 : i32
    %c0_i32_0 = arith.constant 0 : i32
    %c0_i32_1 = arith.constant 0 : i32
    return %c0_i32, %c0_i32_0 : i32, i32
  }
  func.func @transform_6(%arg0: i32) -> (i32, i32) {
    %c0_i32 = arith.constant 0 : i32
    %c0_i32_0 = arith.constant 0 : i32
    %c0_i32_1 = arith.constant 0 : i32
    return %c0_i32, %c0_i32_0 : i32, i32
  }
  func.func @transform_7(%arg0: i32) -> (i32, i32) {
    %c0_i32 = arith.constant 0 : i32
    %c0_i32_0 = arith.constant 0 : i32
    return %arg0, %c0_i32 : i32, i32
  }
}

</mosaic_0001>

<bundles_post_ra>
// kernel: duel_dqn_forward.1
= control target key start
LH: loop header
LB: loop body
LE: loop exit
PB: predicated region body
PF: predicated region fallthrough
CT: control target
= control target key end

     0   :  { %vm58_vm0 = vcmask 1040384   ;;  %vm59_vm1 = vcmask 1041408   ;;  %v435_v1 = vmov 65535   ;;  %vm54_vm2 = vcmask 154624   ;;  %s570_s1 = inlined_call_operand.vmem [shape: bf16[19,256], index: 1, kind: input, shape index: {}]   ;;  %s571_s3 = inlined_call_operand.vmem [shape: bf16[256,11], index: 3, kind: input, shape index: {}]   ;;  %s572_s0 = inlined_call_operand.vmem [shape: f32[16,19], index: 0, kind: input, shape index: {}]   ;;  %s573_s4 = inlined_call_operand.vmem [shape: f32[1,11], index: 4, kind: input, shape index: {}]   ;;  %s574_s2 = inlined_call_operand.vmem [shape: f32[1,256], index: 2, kind: input, shape index: {}]   ;;  %s575_s6 = inlined_call_operand.vmem [shape: f32[1,9], index: 6, kind: input, shape index: {}]   ;;  %s576_s5 = inlined_call_operand.vmem [shape: bf16[9,9], index: 5, kind: input, shape index: {}]   ;;  %s577_s7 = inlined_call_operand.vmem [shape: f32[16,9], index: 7, kind: output, shape index: {}]  }
   0x1   :  { %v32_v0 = vld [vmem:[%s570_s1 + $0x10] sm:$0x33]  ;;  %v60_v2 = vsel %vm58_vm0, 4294967295, %v435_v1  ;;  %v417_v6 = vld [vmem:[%s571_s3 + $0x38] sm:$0xff]  ;;  %v331_v10 = vld [vmem:[%s570_s1] sm:$0xf] }
   0x2   :  { %v46_v3 = vunpack.c.l.b16 %v32_v0  ;;  %v47_v4 = vunpack.c.h.b16 %v32_v0  ;;  %v61_v5 = vsel %vm59_vm1, %v60_v2, 0  ;;  %v425_v7 = vld [vmem:[%s571_s3 + $0x78] sm:$0xff]  ;;  %v409_v11 = vld [vmem:[%s570_s1 + $0x4] sm:$0xf0]  ;;  %v408_v12 = vld [vmem:[%s570_s1 + $0x4] sm:$0xf]  ;;  %234 = vmatpush.bf16.msra.mxu2 %v417_v6 }
   0x3   :  { %v333_v13 = vld [vmem:[%s570_s1 + $0x8] sm:$0xf0]  ;;  %248 = vmatpush.bf16.msra.mxu3 %v425_v7  ;;  %v416_v14 = vld [vmem:[%s571_s3 + $0x30] sm:$0xff]  ;;  %v332_v18 = vor.u32 %v409_v11, %v331_v10  ;;  %v27_v20 = vld [vmem:[%s572_s0] sm:$0xff]  ;;  %v436_v52 = vmov 9   ;;  %v437_v53 = vmov 10  }
   0x4   :  { %v50_v8 = vpack.c.b16 %v46_v3, %v46_v3  ;;  %v51_v9 = vpack.c.b16 %v47_v4, %v47_v4  ;;  %v424_v15 = vld [vmem:[%s571_s3 + $0x70] sm:$0xff]  ;;  %v336_v19 = vor.u32 %v408_v12, %v333_v13  ;;  %v28_v21 = vld [vmem:[%s572_s0 + $0x8] sm:$0xff]  ;;  %v414_v25 = vld [vmem:[%s571_s3 + $0x20] sm:$0xff]  ;;  %431 = vset.pattern.permute.xlu1 %v436_v52  ;;  %430 = vset.pattern.permute.xlu0 %v437_v53  ;;  %vm302_vm3 = vcmask 1043456  }
   0x5   :  { %v415_v22 = vld [vmem:[%s571_s3 + $0x28] sm:$0xff]  ;;  %v29_v24 = vpack.c.bf16 %v28_v21, %v27_v20  ;;  %v422_v26 = vld [vmem:[%s571_s3 + $0x60] sm:$0xff]  ;;  %v413_v27 = vld [vmem:[%s571_s3 + $0x18] sm:$0xff]  ;;  %vm303_vm4 = vcmask 1044480   ;;  %v304_v3 = vsel %vm302_vm3, 4294967295, %v435_v1  ;;  %vm298_vm5 = vcmask 72704  }
   0x6   :  { %v63_v16 = vand.u32 %v61_v5, %v50_v8  ;;  %v66_v17 = vand.u32 %v61_v5, %v51_v9  ;;  %235 = vmatpush.bf16.msra.mxu2 %v416_v14  ;;  %v423_v23 = vld [vmem:[%s571_s3 + $0x68] sm:$0xff]  ;;  %v421_v28 = vld [vmem:[%s571_s3 + $0x58] sm:$0xff]  ;;  %v412_v29 = vld [vmem:[%s571_s3 + $0x10] sm:$0xff]  ;;  %v305_v4 = vsel %vm303_vm4, %v304_v3, 0 }
   0x7   :  { %249 = vmatpush.bf16.msra.mxu3 %v424_v15  ;;  %v420_v30 = vld [vmem:[%s571_s3 + $0x50] sm:$0xff]  ;;  %v411_v31 = vld [vmem:[%s571_s3 + $0x8] sm:$0xff]  ;;  %v410_v33 = vld [vmem:[%s571_s3] sm:$0xff] }
   0x8   :  { %74 = vmatpush.bf16.msra.mxu0 %v63_v16  ;;  %88 = vmatpush.bf16.msra.mxu1 %v66_v17  ;;  %v419_v32 = vld [vmem:[%s571_s3 + $0x48] sm:$0xff]  ;;  %v418_v34 = vld [vmem:[%s571_s3 + $0x40] sm:$0xff] }
   0x9   :  { %v33_v35 = vld [vmem:[%s574_s2] sm:$0x3]  ;;  %v426_v0 = vld [vmem:[%s576_s5] sm:$0x10] }
   0xa   :  { %236 = vmatpush.bf16.msra.mxu2 %v415_v22  ;;  %v35_v38 = vperm.slane %v33_v35, 0  ;;  %v36_v39 = vperm.slane %v33_v35, 1  ;;  %v433_v54 = vld [vmem:[%s573_s4] ss:$0 sm:$0xff] }
   0xb   :  { %250 = vmatpush.bf16.msra.mxu3 %v423_v23  ;;  %v405_v63 = vld [vmem:[%s576_s5] sm:$0xf] }
   0xc   :  { %75 = vmatpush.bf16.msra.mxu0 %v332_v18  ;;  %89 = vmatpush.bf16.msra.mxu1 %v336_v19  ;;  %v406_v2 = vor.u32 %v426_v0, %v405_v63  ;;  %v434_v1 = vld [vmem:[%s575_s6] ss:$0 sm:$0xff] }
   0xe   :  { %237 = vmatpush.bf16.msra.mxu2 %v414_v25  ;;  %v307_v5 = vand.u32 %v406_v2, %v305_v4 }
   0xf   :  { %337 = vmatmul.msk.bf16.vlgmr.msra.gmra.mxu0 %vm54_vm2, %v29_v24  ;;  %338 = vmatmul.msk.bf16.vlgmr.msra.gmra.mxu1 %vm54_vm2, %v29_v24 }
  0x10   :  { %251 = vmatpush.bf16.msra.mxu3 %v422_v26  ;;  %316 = vmatpush.bf16.msrb.mxu0 %v307_v5 }
  0x12   :  { %238 = vmatpush.bf16.msra.mxu2 %v413_v27 }
  0x14   :  { %252 = vmatpush.bf16.msra.mxu3 %v421_v28 }
  0x16   :  { %239 = vmatpush.bf16.msra.mxu2 %v412_v29 }
  0x18   :  { %253 = vmatpush.bf16.msra.mxu3 %v420_v30 }
  0x1a   :  { %240 = vmatpush.bf16.msra.mxu2 %v411_v31 }
  0x1c   :  { %254 = vmatpush.bf16.msra.mxu3 %v419_v32 }
  0x1e   :  { %241 = vmatpush.bf16.msra.mxu2 %v410_v33 }
  0x20   :  { %255 = vmatpush.bf16.msra.mxu3 %v418_v34 }
  0x8c   :  { %v77_v36 = vpop.f32.mrf.mxu0  ;;  %v91_v37 = vpop.f32.mrf.mxu1 }
  0x8d   :  { %v78_v40 = vadd.f32 %v77_v36, %v35_v38  ;;  %v92_v41 = vadd.f32 %v91_v37, %v36_v39 }
  0x8f   :  { %v96_v46 = vmax.f32 %v78_v40, 0.0  ;;  %v97_v47 = vmax.f32 %v92_v41, 0.0 }
  0x94   :  { %v79_v42 = vpop.f32.mrf.mxu0  ;;  %v93_v43 = vpop.f32.mrf.mxu1 }
  0x95   :  { %v80_v44 = vadd.f32 %v79_v42, %v35_v38  ;;  %v94_v45 = vadd.f32 %v93_v43, %v36_v39 }
  0x97   :  { %v98_v48 = vmax.f32 %v80_v44, 0.0  ;;  %v99_v49 = vmax.f32 %v94_v45, 0.0 }
  0x99   :  { %v100_v50 = vpack.c.bf16 %v98_v48, %v96_v46  ;;  %v101_v51 = vpack.c.bf16 %v99_v49, %v97_v47 }
  0x9b   :  { %242 = vmatmul.bf16.vlgmr.msra.gmra.mxu2 %v100_v50  ;;  %256 = vmatmul.bf16.vlgmr.msra.gmra.mxu3 %v101_v51 }
 0x11e   :  { %v243_v55 = vpop.f32.mrf.mxu2  ;;  %v257_v56 = vpop.f32.mrf.mxu3 }
 0x11f   :  { %v244_v57 = vadd.f32 %v433_v54, %v243_v55 }
 0x121   :  { %v258_v58 = vadd.f32 %v257_v56, %v244_v57 }
 0x123   :  { %275 = vperm.xlu1 %431, %v258_v58   ;;  %264 = vperm.xlu0 %430, %v258_v58  }
 0x126   :  { %v245_v59 = vpop.f32.mrf.mxu2  ;;  %v259_v61 = vpop.f32.mrf.mxu3 }
 0x127   :  { %v246_v60 = vadd.f32 %v433_v54, %v245_v59 }
 0x129   :  { %v260_v62 = vadd.f32 %v259_v61, %v246_v60 }
 0x12b   :  { %279 = vperm.xlu1 %431, %v260_v62   ;;  %269 = vperm.xlu0 %430, %v260_v62  }
 0x133   :  { %432 = vset.pattern.permute.xlu0 %v436_v52 }
 0x195   :  { %v276_v6 = vpop.permute.xlu1 %275  ;;  %v265_v7 = vpop.permute.xlu0 %264 }
 0x196   :  { %v272_v8 = vsub.f32 %v258_v58, %v265_v7 }
 0x198   :  { %v282_v10 = vadd.f32 %v276_v6, %v272_v8 }
 0x19a   :  { %v284_v14 = vmax.f32 %v282_v10, 0.0 }
 0x19d   :  { %v270_v9 = vpop.permute.xlu0 %269  ;;  %v280_v12 = vpop.permute.xlu1 %279 }
 0x19e   :  { %v273_v11 = vsub.f32 %v260_v62, %v270_v9 }
 0x1a0   :  { %v283_v13 = vadd.f32 %v280_v12, %v273_v11 }
 0x1a2   :  { %v285_v15 = vmax.f32 %v283_v13, 0.0 }
 0x1a4   :  { %v286_v16 = vpack.c.bf16 %v285_v15, %v284_v14 }
 0x1a6   :  { %407 = vmatmul.msk.bf16.vlgmr.msrb.gmra.mxu0 %vm298_vm5, %v286_v16 }
 0x223   :  { %v318_v17 = vpop.f32.mrf.mxu0 }
 0x224   :  { %v319_v18 = vadd.f32 %v434_v1, %v318_v17 }
 0x226   :  { %323 = vst.msk [vmem:[%s577_s7] sm:$0xff] %vm298_vm5, %v319_v18 }
 0x22b   :  { %v320_v19 = vpop.f32.mrf.mxu0 }
 0x22c   :  { %v321_v20 = vadd.f32 %v434_v1, %v320_v19 }
 0x22e   :  { %324 = vst.msk [vmem:[%s577_s7 + $0x8] sm:$0xff] %vm298_vm5, %v321_v20 }

</bundles_post_ra>
